<compile_context>
chip_gen: v7x
topology: tpu7x:2x2x1
jax: 0.10.0
libtpu: 0.0.40
codegen_flags: <defaults>
</compile_context>

<pallas_src>
import functools

import jax
import jax.numpy as jnp
from jax import lax
from jax.experimental import pallas as pl
from jax.experimental.pallas import tpu as pltpu

XI = 1e-6          # VATLoss xi
EPS = 2.0          # VATLoss eps
IP = 1             # VATLoss ip
NORM_EPS = 1e-12   # F.normalize default eps


# -----------------------------------------------------------------------------
# Fused kernel
# -----------------------------------------------------------------------------
def _log_softmax(logits):
    m = jnp.max(logits, axis=-1, keepdims=True)
    s = logits - m
    lse = jnp.log(jnp.sum(jnp.exp(s), axis=-1, keepdims=True))
    return s - lse


def vat_loss_kernel(x_ref, d_ref, wt_ref, b_ref, kl_ref, *,
                    xi, eps, ip, num_ch, hw):
    # ---- clean forward (hoisted, computed exactly once per block) -----------
    x = x_ref[...]                       # [TB, D]  f32
    wt = wt_ref[...]                     # [K, D]   f32, lane-dense layout
    b = b_ref[...]                       # [1, K]   f32

    x_bf = x.astype(jnp.bfloat16)
    wt_bf = wt.astype(jnp.bfloat16)

    # logits_x = x @ W + b, with W stored transposed: contract lane axes.
    logits_x = lax.dot_general(x_bf, wt_bf, (((1,), (1,)), ((), ())),
                               preferred_element_type=jnp.float32) + b
    logpred = _log_softmax(logits_x)     # log softmax(model(x)) — reused in KL
    pred = jnp.exp(logpred)              # softmax(model(x), dim=1)

    def normalize(d_full):
        # F.normalize(., dim=1) on NCHW: per-(b,h,w) L2-normalize over C.
        # Channel chunks are lane slices at hw (=256) boundaries: aligned, free.
        ch = d_full[:, 0:hw]
        nrm2 = ch * ch
        for c in range(1, num_ch):
            ch = d_full[:, c * hw:(c + 1) * hw]
            nrm2 = nrm2 + ch * ch
        # rsqrt(max(n2, eps^2)) == 1 / max(||.||, eps); rsqrt goes to the EUP.
        inv = lax.rsqrt(jnp.maximum(nrm2, NORM_EPS * NORM_EPS))   # [TB, hw]
        return d_full * jnp.concatenate([inv] * num_ch, axis=1)

    def perturbed_logp(d_full, coef):
        # model(x + coef*d) = logits_x + coef * (d @ W)   (linear model)
        dw = lax.dot_general(d_full.astype(jnp.bfloat16), wt_bf,
                             (((1,), (1,)), ((), ())),
                             preferred_element_type=jnp.float32)
        return _log_softmax(logits_x + coef * dw)

    # ---- d = normalize(rand - 0.5) -------------------------------------------
    d = normalize(d_ref[...])

    # ---- power iteration for the adversarial direction ----------------------
    for _ in range(ip):
        logp_hat = perturbed_logp(d, xi)
        # Exact dKL/dlogits_hat ∝ softmax(logits_hat) - pred (xi, 1/B dropped:
        # positive scalars vanish under the normalization below).
        g = jnp.exp(logp_hat) - pred                               # [TB, K]
        grad = jnp.dot(g.astype(jnp.bfloat16), wt_bf,              # [TB, D]
                       preferred_element_type=jnp.float32)
        d = normalize(grad)

    # ---- final eps-scaled pass: KL only --------------------------------------
    logp_hat = perturbed_logp(d, eps)
    # F.kl_div(logp_hat, pred, reduction='batchmean') numerator for this block:
    block_kl = jnp.sum(pred * (logpred - logp_hat))
    # Lane-dense (1, 128) store of the block partial (read lane 0 outside).
    kl_ref[...] = jnp.full(kl_ref.shape, block_kl, dtype=kl_ref.dtype)


# -----------------------------------------------------------------------------
# Wrapper
# -----------------------------------------------------------------------------
def vat_loss(x, w, b, key, *, xi=XI, eps=EPS, ip=IP, block_b=256):
    """Forward of VATLoss(model, x) with model = linear classifier (w, b)."""
    bsz, c, h, w_sp = x.shape
    d_dim = c * h * w_sp
    k = w.shape[1]

    x_flat = x.reshape(bsz, d_dim).astype(jnp.float32)
    w_t = jnp.transpose(w).astype(jnp.float32)          # [K, D]: lanes = D
    b2 = b.reshape(1, k).astype(jnp.float32)

    # d = rand(shape) - 0.5, same distribution as torch.rand(...).sub(0.5).
    d0 = jax.random.uniform(key, (bsz, d_dim), dtype=jnp.float32) - 0.5

    tb = min(bsz, block_b)
    assert bsz % tb == 0, "demo wrapper assumes batch divisible by block size"
    nb = bsz // tb

    kernel = functools.partial(vat_loss_kernel,
                               xi=float(xi), eps=float(eps), ip=int(ip),
                               num_ch=int(c), hw=int(h * w_sp))

    partials = pl.pallas_call(
        kernel,
        out_shape=jax.ShapeDtypeStruct((nb, 128), jnp.float32),
        grid=(nb,),
        in_specs=[
            pl.BlockSpec((tb, d_dim), lambda i: (i, 0)),   # x block
            pl.BlockSpec((tb, d_dim), lambda i: (i, 0)),   # d block
            pl.BlockSpec((k, d_dim), lambda i: (0, 0)),    # W^T resident
            pl.BlockSpec((1, k), lambda i: (0, 0)),        # bias resident
        ],
        out_specs=pl.BlockSpec((1, 128), lambda i: (i, 0)),
        compiler_params=pltpu.CompilerParams(
            dimension_semantics=("parallel",),             # both TCs on v7x
        ),
    )(x_flat, d0, w_t, b2)

    # batchmean reduction: tiny per-block partial vector reduced outside.
    return jnp.sum(partials[:, 0]) / bsz


# -----------------------------------------------------------------------------
# Main
# -----------------------------------------------------------------------------
if __name__ == "__main__":
    key = jax.random.PRNGKey(0)
    kx, kd, kw = jax.random.split(key, 3)

    B, C, H, W_SP = 2, 4, 16, 16
    K = 8
    D = C * H * W_SP

    x = jax.random.normal(kx, (B, C, H, W_SP), dtype=jnp.float32)
    # Deterministic synthetic model parameters.
    W = 0.05 * jax.random.normal(kw, (D, K), dtype=jnp.float32)
    b = jnp.zeros((1, K), dtype=jnp.float32)

    lds = vat_loss(x, W, b, kd)
    jax.block_until_ready(lds)
    assert lds.shape == () and bool(jnp.isfinite(lds))
    print("KERNEL_OK")
</pallas_src>

<mosaic_0001>
module attributes {stable_mosaic.version = 11 : i64} {
  func.func @vat_loss_kernel(%arg0: i32, %arg1: memref<2x1024xf32, #tpu.memory_space<vmem>>, %arg2: memref<2x1024xf32, #tpu.memory_space<vmem>>, %arg3: memref<8x1024xf32, #tpu.memory_space<vmem>>, %arg4: memref<1x8xf32, #tpu.memory_space<vmem>>, %arg5: memref<1x128xf32, #tpu.memory_space<vmem>>) attributes {dimension_semantics = [#tpu.dimension_semantics<parallel>], iteration_bounds = array<i64: 1>, scalar_prefetch = 0 : i64, scratch_operands = 0 : i64, tpu.core_type = #tpu.core_type<tc>, window_params = [{transform_indices = @transform_0, window_bounds = array<i64: 2, 1024>}, {transform_indices = @transform_1, window_bounds = array<i64: 2, 1024>}, {pipeline_mode = #tpu.pipeline_mode<synchronous>, transform_indices = @transform_2, window_bounds = array<i64: 8, 1024>}, {pipeline_mode = #tpu.pipeline_mode<synchronous>, transform_indices = @transform_3, window_bounds = array<i64: 1, 8>}, {transform_indices = @transform_4, window_bounds = array<i64: 1, 128>}]} {
    %c0 = arith.constant 0 : index
    %c0_0 = arith.constant 0 : index
    %0 = vector.load %arg1[%c0, %c0_0] : memref<2x1024xf32, #tpu.memory_space<vmem>>, vector<2x1024xf32>
    %c0_1 = arith.constant 0 : index
    %c0_2 = arith.constant 0 : index
    %1 = vector.load %arg3[%c0_1, %c0_2] : memref<8x1024xf32, #tpu.memory_space<vmem>>, vector<8x1024xf32>
    %c0_3 = arith.constant 0 : index
    %c0_4 = arith.constant 0 : index
    %2 = vector.load %arg4[%c0_3, %c0_4] : memref<1x8xf32, #tpu.memory_space<vmem>>, vector<1x8xf32>
    %3 = arith.truncf %0 : vector<2x1024xf32> to vector<2x1024xbf16>
    %4 = arith.truncf %1 : vector<8x1024xf32> to vector<8x1024xbf16>
    %cst = arith.constant dense<0.000000e+00> : vector<2x8xf32>
    %5 = tpu.matmul %3, %4, %cst {dimension_numbers = #tpu.dot_dimension_numbers<[1], [1], [0], [0], [0, 0, 1, 0], [], []>} : vector<2x1024xbf16>, vector<8x1024xbf16>, vector<2x8xf32> -> vector<2x8xf32>
    %6 = vector.broadcast %2 : vector<1x8xf32> to vector<2x8xf32>
    %7 = arith.addf %5, %6 : vector<2x8xf32>
    %cst_5 = arith.constant dense<0xFF800000> : vector<2xf32>
    %8 = vector.multi_reduction <maximumf>, %7, %cst_5 [1] : vector<2x8xf32> to vector<2xf32>
    %9 = vector.shape_cast %8 : vector<2xf32> to vector<2x1xf32>
    %10 = vector.broadcast %9 : vector<2x1xf32> to vector<2x8xf32>
    %11 = arith.subf %7, %10 : vector<2x8xf32>
    %12 = math.exp %11 : vector<2x8xf32>
    %cst_6 = arith.constant dense<0.000000e+00> : vector<2xf32>
    %13 = vector.multi_reduction <add>, %12, %cst_6 [1] : vector<2x8xf32> to vector<2xf32>
    %14 = vector.shape_cast %13 : vector<2xf32> to vector<2x1xf32>
    %15 = math.log %14 : vector<2x1xf32>
    %16 = vector.broadcast %15 : vector<2x1xf32> to vector<2x8xf32>
    %17 = arith.subf %11, %16 : vector<2x8xf32>
    %18 = math.exp %17 : vector<2x8xf32>
    %c0_7 = arith.constant 0 : index
    %c0_8 = arith.constant 0 : index
    %19 = vector.load %arg2[%c0_7, %c0_8] : memref<2x1024xf32, #tpu.memory_space<vmem>>, vector<2x1024xf32>
    %20 = vector.extract_strided_slice %19 {offsets = [0, 0], sizes = [2, 256], strides = [1, 1]} : vector<2x1024xf32> to vector<2x256xf32>
    %21 = arith.mulf %20, %20 : vector<2x256xf32>
    %22 = vector.extract_strided_slice %19 {offsets = [0, 256], sizes = [2, 256], strides = [1, 1]} : vector<2x1024xf32> to vector<2x256xf32>
    %23 = arith.mulf %22, %22 : vector<2x256xf32>
    %24 = arith.addf %21, %23 : vector<2x256xf32>
    %25 = vector.extract_strided_slice %19 {offsets = [0, 512], sizes = [2, 256], strides = [1, 1]} : vector<2x1024xf32> to vector<2x256xf32>
    %26 = arith.mulf %25, %25 : vector<2x256xf32>
    %27 = arith.addf %24, %26 : vector<2x256xf32>
    %28 = vector.extract_strided_slice %19 {offsets = [0, 768], sizes = [2, 256], strides = [1, 1]} : vector<2x1024xf32> to vector<2x256xf32>
    %29 = arith.mulf %28, %28 : vector<2x256xf32>
    %30 = arith.addf %27, %29 : vector<2x256xf32>
    %cst_9 = arith.constant 1.000000e-24 : f32
    %31 = vector.broadcast %cst_9 : f32 to vector<2x256xf32>
    %32 = arith.maximumf %30, %31 : vector<2x256xf32>
    %33 = math.rsqrt %32 : vector<2x256xf32>
    %34 = tpu.concatenate %33, %33, %33, %33 in 1 : vector<2x256xf32>, vector<2x256xf32>, vector<2x256xf32>, vector<2x256xf32> -> vector<2x1024xf32>
    %35 = arith.mulf %19, %34 : vector<2x1024xf32>
    %36 = arith.truncf %35 : vector<2x1024xf32> to vector<2x1024xbf16>
    %cst_10 = arith.constant dense<0.000000e+00> : vector<2x8xf32>
    %37 = tpu.matmul %36, %4, %cst_10 {dimension_numbers = #tpu.dot_dimension_numbers<[1], [1], [0], [0], [0, 0, 1, 0], [], []>} : vector<2x1024xbf16>, vector<8x1024xbf16>, vector<2x8xf32> -> vector<2x8xf32>
    %cst_11 = arith.constant 9.99999997E-7 : f32
    %38 = vector.broadcast %cst_11 : f32 to vector<2x8xf32>
    %39 = arith.mulf %38, %37 : vector<2x8xf32>
    %40 = arith.addf %7, %39 : vector<2x8xf32>
    %cst_12 = arith.constant dense<0xFF800000> : vector<2xf32>
    %41 = vector.multi_reduction <maximumf>, %40, %cst_12 [1] : vector<2x8xf32> to vector<2xf32>
    %42 = vector.shape_cast %41 : vector<2xf32> to vector<2x1xf32>
    %43 = vector.broadcast %42 : vector<2x1xf32> to vector<2x8xf32>
    %44 = arith.subf %40, %43 : vector<2x8xf32>
    %45 = math.exp %44 : vector<2x8xf32>
    %cst_13 = arith.constant dense<0.000000e+00> : vector<2xf32>
    %46 = vector.multi_reduction <add>, %45, %cst_13 [1] : vector<2x8xf32> to vector<2xf32>
    %47 = vector.shape_cast %46 : vector<2xf32> to vector<2x1xf32>
    %48 = math.log %47 : vector<2x1xf32>
    %49 = vector.broadcast %48 : vector<2x1xf32> to vector<2x8xf32>
    %50 = arith.subf %44, %49 : vector<2x8xf32>
    %51 = math.exp %50 : vector<2x8xf32>
    %52 = arith.subf %51, %18 : vector<2x8xf32>
    %53 = arith.truncf %52 : vector<2x8xf32> to vector<2x8xbf16>
    %cst_14 = arith.constant dense<0.000000e+00> : vector<2x1024xf32>
    %54 = tpu.matmul %53, %4, %cst_14 {dimension_numbers = #tpu.dot_dimension_numbers<[1], [0], [0], [1], [0, 0, 1, 1], [], []>} : vector<2x8xbf16>, vector<8x1024xbf16>, vector<2x1024xf32> -> vector<2x1024xf32>
    %55 = vector.extract_strided_slice %54 {offsets = [0, 0], sizes = [2, 256], strides = [1, 1]} : vector<2x1024xf32> to vector<2x256xf32>
    %56 = arith.mulf %55, %55 : vector<2x256xf32>
    %57 = vector.extract_strided_slice %54 {offsets = [0, 256], sizes = [2, 256], strides = [1, 1]} : vector<2x1024xf32> to vector<2x256xf32>
    %58 = arith.mulf %57, %57 : vector<2x256xf32>
    %59 = arith.addf %56, %58 : vector<2x256xf32>
    %60 = vector.extract_strided_slice %54 {offsets = [0, 512], sizes = [2, 256], strides = [1, 1]} : vector<2x1024xf32> to vector<2x256xf32>
    %61 = arith.mulf %60, %60 : vector<2x256xf32>
    %62 = arith.addf %59, %61 : vector<2x256xf32>
    %63 = vector.extract_strided_slice %54 {offsets = [0, 768], sizes = [2, 256], strides = [1, 1]} : vector<2x1024xf32> to vector<2x256xf32>
    %64 = arith.mulf %63, %63 : vector<2x256xf32>
    %65 = arith.addf %62, %64 : vector<2x256xf32>
    %cst_15 = arith.constant 1.000000e-24 : f32
    %66 = vector.broadcast %cst_15 : f32 to vector<2x256xf32>
    %67 = arith.maximumf %65, %66 : vector<2x256xf32>
    %68 = math.rsqrt %67 : vector<2x256xf32>
    %69 = tpu.concatenate %68, %68, %68, %68 in 1 : vector<2x256xf32>, vector<2x256xf32>, vector<2x256xf32>, vector<2x256xf32> -> vector<2x1024xf32>
    %70 = arith.mulf %54, %69 : vector<2x1024xf32>
    %71 = arith.truncf %70 : vector<2x1024xf32> to vector<2x1024xbf16>
    %cst_16 = arith.constant dense<0.000000e+00> : vector<2x8xf32>
    %72 = tpu.matmul %71, %4, %cst_16 {dimension_numbers = #tpu.dot_dimension_numbers<[1], [1], [0], [0], [0, 0, 1, 0], [], []>} : vector<2x1024xbf16>, vector<8x1024xbf16>, vector<2x8xf32> -> vector<2x8xf32>
    %cst_17 = arith.constant 2.000000e+00 : f32
    %73 = vector.broadcast %cst_17 : f32 to vector<2x8xf32>
    %74 = arith.mulf %73, %72 : vector<2x8xf32>
    %75 = arith.addf %7, %74 : vector<2x8xf32>
    %cst_18 = arith.constant dense<0xFF800000> : vector<2xf32>
    %76 = vector.multi_reduction <maximumf>, %75, %cst_18 [1] : vector<2x8xf32> to vector<2xf32>
    %77 = vector.shape_cast %76 : vector<2xf32> to vector<2x1xf32>
    %78 = vector.broadcast %77 : vector<2x1xf32> to vector<2x8xf32>
    %79 = arith.subf %75, %78 : vector<2x8xf32>
    %80 = math.exp %79 : vector<2x8xf32>
    %cst_19 = arith.constant dense<0.000000e+00> : vector<2xf32>
    %81 = vector.multi_reduction <add>, %80, %cst_19 [1] : vector<2x8xf32> to vector<2xf32>
    %82 = vector.shape_cast %81 : vector<2xf32> to vector<2x1xf32>
    %83 = math.log %82 : vector<2x1xf32>
    %84 = vector.broadcast %83 : vector<2x1xf32> to vector<2x8xf32>
    %85 = arith.subf %79, %84 : vector<2x8xf32>
    %86 = arith.subf %17, %85 : vector<2x8xf32>
    %87 = arith.mulf %18, %86 : vector<2x8xf32>
    %88 = vector.shape_cast %87 : vector<2x8xf32> to vector<1x2x8xf32>
    %cst_20 = arith.constant dense<0.000000e+00> : vector<1xf32>
    %89 = vector.multi_reduction <add>, %88, %cst_20 [1, 2] : vector<1x2x8xf32> to vector<1xf32>
    %90 = vector.shape_cast %89 : vector<1xf32> to vector<1x1x1xf32>
    %91 = vector.extract %90[0, 0, 0] : f32 from vector<1x1x1xf32>
    %92 = vector.broadcast %91 : f32 to vector<1x128xf32>
    %c0_21 = arith.constant 0 : index
    %c0_22 = arith.constant 0 : index
    %93 = vector.load %arg5[%c0_21, %c0_22] : memref<1x128xf32, #tpu.memory_space<vmem>>, vector<1x128xf32>
    tpu.vector_store %arg5[%c0_21, %c0_22], %92 {strides = array<i32>} : memref<1x128xf32, #tpu.memory_space<vmem>>, vector<1x128xf32>,
    return
  }
  func.func @transform_0(%arg0: i32) -> (i32, i32) {
    %c0_i32 = arith.constant 0 : i32
    %c0_i32_0 = arith.constant 0 : i32
    return %arg0, %c0_i32 : i32, i32
  }
  func.func @transform_1(%arg0: i32) -> (i32, i32) {
    %c0_i32 = arith.constant 0 : i32
    %c0_i32_0 = arith.constant 0 : i32
    return %arg0, %c0_i32 : i32, i32
  }
  func.func @transform_2(%arg0: i32) -> (i32, i32) {
    %c0_i32 = arith.constant 0 : i32
    %c0_i32_0 = arith.constant 0 : i32
    %c0_i32_1 = arith.constant 0 : i32
    return %c0_i32, %c0_i32_0 : i32, i32
  }
  func.func @transform_3(%arg0: i32) -> (i32, i32) {
    %c0_i32 = arith.constant 0 : i32
    %c0_i32_0 = arith.constant 0 : i32
    %c0_i32_1 = arith.constant 0 : i32
    return %c0_i32, %c0_i32_0 : i32, i32
  }
  func.func @transform_4(%arg0: i32) -> (i32, i32) {
    %c0_i32 = arith.constant 0 : i32
    %c0_i32_0 = arith.constant 0 : i32
    return %arg0, %c0_i32 : i32, i32
  }
}

</mosaic_0001>

<bundles_post_ra>
// kernel: tpu_custom_call.1
= control target key start
LH: loop header
LB: loop body
LE: loop exit
PB: predicated region body
PF: predicated region fallthrough
CT: control target
= control target key end

     0   :  { %9 = vsyncpa [#allocation3], 0  ;;  %s1345_s0 = inlined_call_operand.hbm [shape: f32[2,1024], index: 0, kind: input, shape index: {}]   ;;  %s1346_s1 = inlined_call_operand.hbm [shape: f32[2,1024], index: 1, kind: input, shape index: {}]   ;;  %s1347_s2 = inlined_call_operand.hbm [shape: f32[8,1024], index: 2, kind: input, shape index: {}]   ;;  %s1348_s3 = inlined_call_operand.vmem [shape: f32[1,8], index: 3, kind: input, shape index: {}]   ;;  %s1349_s4 = inlined_call_operand.hbm [shape: f32[1,128], index: 4, kind: output, shape index: {}]  }
   0x1   :  { %10 = vsyncpa [#allocation6], 0 }
   0x2   :  { %11 = vsyncpa [#allocation4], 0  ;;  %s1174_s15 = smov [#allocation5]   ;;  %s1175_s17 = smov [#allocation2]  }
   0x3   :  { %s28_s16 = sshll.u32 %s1174_s15, 4  ;;  %s18_s18 = sshll.u32 %s1175_s17, 4  ;;  %s29_s16 = int_to_ptr.vmem [resolvable:$true] %s28_s16  ;;  %s19_s18 = int_to_ptr.vmem [resolvable:$true] %s18_s18 }
   0x4   :  { %s1080_s21 = scalar_lea.hbm %s1346_s1, 256 }
   0x5   :  { %p1081_p0 = scmp.ne.s32.totalorder %s1346_s1, %s1080_s21  ;;  %p1084_p1 = scmp.lt.u32.totalorder %s1080_s21, %s1346_s1 }
   0x7   :  { %p1086_p2 = pnand %p1084_p1, %p1081_p0 }
   0x9   :  { %1089 = shalt.err (!%p1086_p2)
}
   0xa   :  { %s1090_s26 = scalar_lea.vmem %s29_s16, 256  ;;  %p1095_p4 = scmp.lt.s32.totalorder %s29_s16, %s29_s16 }
   0xb   :  { %p1091_p3 = scmp.ne.s32.totalorder %s29_s16, %s1090_s26  ;;  %p1096_p5 = scmp.lt.s32.totalorder %s1090_s26, %s1090_s26 }
   0xd   :  { %p1097_p6 = por %p1096_p5, %p1095_p4 }
   0xf   :  { %p1098_p7 = pnand %p1097_p6, %p1091_p3 }
  0x11   :  { %1101 = shalt.err (!%p1098_p7)
}
  0x12   :  { %31 = dma.hbm_to_vmem [thread:$0]  %s1346_s1, 256, %s29_s16, [#allocation6]  }
  0x13   :  { %s1102_s5 = scalar_lea.hbm %s1345_s0, 256 }
  0x14   :  { %p1103_p8 = scmp.ne.s32.totalorder %s1345_s0, %s1102_s5  ;;  %p1106_p9 = scmp.lt.u32.totalorder %s1102_s5, %s1345_s0 }
  0x16   :  { %p1108_p10 = pnand %p1106_p9, %p1103_p8 }
  0x18   :  { %1111 = shalt.err (!%p1108_p10)
}
  0x19   :  { %s1112_s10 = scalar_lea.vmem %s19_s18, 256  ;;  %p1117_p12 = scmp.lt.s32.totalorder %s19_s18, %s19_s18 }
  0x1a   :  { %p1113_p11 = scmp.ne.s32.totalorder %s19_s18, %s1112_s10  ;;  %p1118_p13 = scmp.lt.s32.totalorder %s1112_s10, %s1112_s10 }
  0x1c   :  { %p1119_p0 = por %p1118_p13, %p1117_p12 }
  0x1e   :  { %p1120_p1 = pnand %p1119_p0, %p1113_p11 }
  0x20   :  { %1123 = shalt.err (!%p1120_p1)
}
  0x21   :  { %21 = dma.hbm_to_vmem [thread:$0]  %s1345_s0, 256, %s19_s18, [#allocation3]  }
  0x22   :  { %s1176_s12 = smov [#allocation7]   ;;  %s1124_s16 = scalar_lea.hbm %s1347_s2, 1024 }
  0x23   :  { %s38_s13 = sshll.u32 %s1176_s12, 4  ;;  %p1125_p2 = scmp.ne.s32.totalorder %s1347_s2, %s1124_s16  ;;  %s39_s13 = int_to_ptr.vmem [resolvable:$true] %s38_s13 }
  0x24   :  { %p1128_p3 = scmp.lt.u32.totalorder %s1124_s16, %s1347_s2 }
  0x26   :  { %p1130_p4 = pnand %p1128_p3, %p1125_p2 }
  0x28   :  { %1133 = shalt.err (!%p1130_p4)
}
  0x29   :  { %s1134_s22 = scalar_lea.vmem %s39_s13, 1024  ;;  %p1139_p6 = scmp.lt.s32.totalorder %s39_s13, %s39_s13 }
  0x2a   :  { %p1135_p5 = scmp.ne.s32.totalorder %s39_s13, %s1134_s22  ;;  %p1140_p7 = scmp.lt.s32.totalorder %s1134_s22, %s1134_s22 }
  0x2c   :  { %p1141_p8 = por %p1140_p7, %p1139_p6 }
  0x2e   :  { %p1142_p9 = pnand %p1141_p8, %p1135_p5 }
  0x30   :  { %1145 = shalt.err (!%p1142_p9)
}
  0x31   :  { %41 = dma.hbm_to_vmem [thread:$0]  %s1347_s2, 1024, %s39_s13, [#allocation6]  }
  0x32   :  { %1168 = dma.done.wait [#allocation3], 256  }
  0x33   :  { %1169 = vsyncadd [#allocation3], 4294967040 }
  0x34   :  { %1170 = dma.done.wait [#allocation6], 1280  }
  0x35   :  { %1171 = vsyncadd [#allocation6], 4294966016  ;;  %v71_v0 = vlaneseq  ;;  %v1177_v1 = vmov 1983009808   ;;  %v57_v6 = vld [vmem:[#allocation7 + $0x8] sm:$0xff]  ;;  %v56_v7 = vld [vmem:[#allocation7] sm:$0xff] }
  0x36   :  { %v69_v2 = vunpack.c.l.s4 %v1177_v1  ;;  %v61_v8 = vld [vmem:[#allocation7 + $0x28] sm:$0xff]  ;;  %v1243_v9 = vpack.c.bf16 %v57_v6, %v57_v6  ;;  %v1245_v10 = vpack.c.bf16 %v56_v7, %v56_v7  ;;  %v60_v12 = vld [vmem:[#allocation7 + $0x20] sm:$0xff]  ;;  %v59_v19 = vld [vmem:[#allocation7 + $0x18] sm:$0xff]  ;;  %vm291_vm0 = vcmask 58368  }
  0x37   :  { %v72_v3 = vshrl.u32 %v71_v0, 7  ;;  %v1247_v11 = vpack.c.bf16 %v61_v8, %v61_v8  ;;  %v54_v13 = vld [vmem:[#allocation2] sm:$0xff]  ;;  %v55_v14 = vld [vmem:[#allocation2 + $0x8] sm:$0xff]  ;;  %v1249_v15 = vpack.c.bf16 %v60_v12, %v60_v12  ;;  %v58_v20 = vld [vmem:[#allocation7 + $0x10] sm:$0xff]  ;;  %v1255_v23 = vpack.c.bf16 %v59_v19, %v59_v19 }
  0x38   :  { %v70_v4 = vunpack.c.0.s8 %v69_v2  ;;  %v67_v16 = vcombine.high %v54_v13, %v54_v13  ;;  %v84_v18 = vcombine.high %v55_v14, %v55_v14  ;;  %v63_v21 = vld [vmem:[#allocation7 + $0x38] sm:$0xff]  ;;  %131 = vmatprep.subr.bf16.mxu1 %v1243_v9  ;;  %v306_v24 = vld [vmem:[#allocation5] sm:$0xff]  ;;  %v1262_v31 = vpack.c.bf16 %v58_v20, %v58_v20 }
  0x39   :  { %211 = vmatprep.subr.bf16.mxu0 %v1247_v11  ;;  %132 = vmatpush1.bf16.xpose.msra.mxu1 %v1245_v10  ;;  %v1259_v26 = vpack.c.bf16 %v63_v21, %v63_v21  ;;  %v307_v27 = vld [vmem:[#allocation5 + $0x8] sm:$0xff]  ;;  %v310_v28 = vrot.slane %v306_v24, 4  ;;  %v62_v32 = vld [vmem:[#allocation7 + $0x30] sm:$0xff]  ;;  %v308_v36 = vmul.f32 %v306_v24, %v306_v24  ;;  %v1005_v21 = vld [vmem:[%s1348_s3] ss:$0 sm:$0xff]  ;;  %vm578_vm1 = vcmask 1043456  }
  0x3a   :  { %v1241_v5 = vsub.s32 %v70_v4, %v72_v3  ;;  %212 = vmatpush1.bf16.xpose.msra.mxu0 %v1249_v15  ;;  %171 = vmatprep.subr.bf16.mxu1 %v1255_v23  ;;  %v314_v41 = vmul.f32 %v307_v27, %v307_v27  ;;  %v1267_v42 = vpack.c.bf16 %v62_v32, %v62_v32  ;;  %v317_v45 = vrot.slane %v307_v27, 4  ;;  %s1179_s3 = smov [#allocation8]  }
  0x3b   :  { %251 = vmatprep.subr.bf16.mxu0 %v1259_v26  ;;  %v312_v37 = vmul.f32 %v310_v28, %v310_v28  ;;  %vm574_vm2 = vcmask 64512   ;;  %s995_s24 = sshll.u32 %s1179_s3, 4  ;;  %s996_s24 = int_to_ptr.vmem [resolvable:$true] %s995_s24 }
  0x3c   :  { %v74_v17 = vrot.slane %v54_v13, %v1241_v5  ;;  %v91_v22 = vrot.slane %v55_v14, %v1241_v5  ;;  %v81_v33 = vrot.slane %v67_v16, %v1241_v5  ;;  %v98_v35 = vrot.slane %v84_v18, %v1241_v5  ;;  %s1146_s26 = scalar_lea.vmem %s996_s24, 16  ;;  %s1150_s27 = scalar_lea.vmem %s996_s24, 32 }
  0x3d   :  { %v313_v44 = vadd.f32 %v312_v37, %v308_v36  ;;  %v319_v49 = vmul.f32 %v317_v45, %v317_v45  ;;  %p1147_p10 = scmp.ne.s32.totalorder %s996_s24, %s1146_s26  ;;  %p1151_p11 = scmp.lt.s32.totalorder %s996_s24, %s996_s24 }
  0x3e   :  { %v82_v25 = vcombine.high %v74_v17, %v74_v17  ;;  %v109_v29 = vpack.c.bf16 %v74_v17, %v74_v17  ;;  %v99_v30 = vcombine.high %v91_v22, %v91_v22  ;;  %v113_v39 = vpack.c.bf16 %v91_v22, %v91_v22  ;;  %p1152_p12 = scmp.lt.s32.totalorder %s1150_s27, %s1146_s26 }
  0x3f   :  { %v83_v40 = vcombine.high %v81_v33, %v81_v33  ;;  %v100_v43 = vcombine.high %v98_v35, %v98_v35  ;;  %v315_v48 = vadd.f32 %v314_v41, %v313_v44  ;;  %v111_v52 = vpack.c.bf16 %v81_v33, %v81_v33 }
  0x40   :  { %v110_v34 = vpack.c.bf16 %v82_v25, %v82_v25  ;;  %v114_v38 = vpack.c.bf16 %v99_v30, %v99_v30  ;;  %v115_v53 = vpack.c.bf16 %v98_v35, %v98_v35  ;;  %p1153_p13 = por %p1152_p12, %p1151_p11 }
  0x41   :  { %v112_v46 = vpack.c.bf16 %v83_v40, %v83_v40  ;;  %v116_v47 = vpack.c.bf16 %v100_v43, %v100_v43  ;;  %v320_v50 = vadd.f32 %v319_v49, %v315_v48 }
  0x42   :  { %163 = vmatprep.mubr.bf16.mxu1 %v110_v34  ;;  %243 = vmatprep.mubr.bf16.mxu0 %v114_v38  ;;  %p1154_p0 = pnand %p1153_p13, %p1147_p10 }
  0x43   :  { %164 = vmatmul.mubr.bf16.vlgmr.msra.gmra.mrb[0].mxu1 %v109_v29  ;;  %244 = vmatmul.mubr.bf16.vlgmr.msra.gmra.mrb[0].mxu0 %v113_v39  ;;  %v321_v51 = vmax.f32 %v320_v50, 1e-24 }
  0x44   :  { %172 = vmatpush1.bf16.xpose.msra.mxu1 %v1262_v31  ;;  %252 = vmatpush1.bf16.xpose.msra.mxu0 %v1267_v42 }
  0x45   :  { %203 = vmatprep.mubr.bf16.mxu1 %v112_v46  ;;  %283 = vmatprep.mubr.bf16.mxu0 %v116_v47  ;;  %1058 = vrsqrt.f32 %v321_v51 }
  0x46   :  { %396 = vmatprep.subr.bf16.mxu1 %v1243_v9  ;;  %1006 = vmatprep.subr.msk.bf16.mxu0 %vm578_vm1, %v1243_v9 }
  0x4f   :  { %204 = vmatmul.mubr.bf16.vlgmr.msra.gmra.mrb[0].mxu1 %v111_v52  ;;  %284 = vmatmul.mubr.bf16.vlgmr.msra.gmra.mrb[0].mxu0 %v115_v53  ;;  %v1059_v54 = vpop.eup %1058  ;;  %v580_v53 = vsel %vm578_vm1, %v1245_v10, 0 }
  0x50   :  { %397 = vmatpush1.bf16.xpose.msra.mxu1 %v1245_v10  ;;  %v330_v55 = vrot.slane %v1059_v54, %v1241_v5  ;;  %v586_v54 = vsel %vm578_vm1, %v1262_v31, 0  ;;  %604 = vmatpush1.bf16.msra.mxu0 %v580_v53 }
  0x51   :  { %436 = vmatprep.subr.bf16.mxu1 %v1255_v23  ;;  %1010 = vmatprep.subr.msk.bf16.mxu0 %vm578_vm1, %v1247_v11 }
  0x52   :  { %v331_v56 = vcombine.high %v330_v55, %v330_v55 }
  0x54   :  { %v332_v57 = vcombine.low %v330_v55, %v331_v56  ;;  %v1178_v55 = vmov 0  }
  0x55   :  { %635 = vmatprep.mubr.bf16.mxu0 %v1178_v55 }
  0x56   :  { %v339_v58 = vrot.slane %v332_v57, %v1241_v5 }
  0x58   :  { %v340_v59 = vcombine.low %v339_v58, %v339_v58 }
  0x5a   :  { %v342_v60 = vmul.f32 %v340_v59, %v306_v24  ;;  %v343_v4 = vmul.f32 %v340_v59, %v307_v27 }
  0x5c   :  { %v353_v61 = vrot.slane %v342_v60, %v1241_v5  ;;  %v346_v62 = vcombine.high %v342_v60, %v342_v60  ;;  %v370_v7 = vrot.slane %v343_v4, %v1241_v5  ;;  %v363_v14 = vcombine.high %v343_v4, %v343_v4 }
  0x5e   :  { %v361_v63 = vcombine.high %v353_v61, %v353_v61  ;;  %v360_v0 = vrot.slane %v346_v62, %v1241_v5  ;;  %v388_v1 = vpack.c.bf16 %v353_v61, %v353_v61  ;;  %v378_v8 = vcombine.high %v370_v7, %v370_v7 }
  0x5f   :  { %v377_v16 = vrot.slane %v363_v14, %v1241_v5  ;;  %v392_v18 = vpack.c.bf16 %v370_v7, %v370_v7  ;;  %v592_v7 = vsel %vm578_vm1, %v1249_v15, 0 }
  0x60   :  { %v389_v2 = vpack.c.bf16 %v361_v63, %v361_v63  ;;  %v362_v3 = vcombine.high %v360_v0, %v360_v0  ;;  %v390_v12 = vpack.c.bf16 %v360_v0, %v360_v0  ;;  %v393_v13 = vpack.c.bf16 %v378_v8, %v378_v8 }
  0x61   :  { %v379_v17 = vcombine.high %v377_v16, %v377_v16  ;;  %v394_v20 = vpack.c.bf16 %v377_v16, %v377_v16  ;;  %v598_v8 = vsel %vm578_vm1, %v1267_v42, 0 }
  0x62   :  { %428 = vmatprep.mubr.bf16.mxu1 %v389_v2  ;;  %v391_v6 = vpack.c.bf16 %v362_v3, %v362_v3 }
  0x63   :  { %429 = vmatmul.mubr.bf16.vlgmr.msra.gmra.mrb[4].mxu1 %v388_v1  ;;  %v395_v19 = vpack.c.bf16 %v379_v17, %v379_v17 }
  0x64   :  { %437 = vmatpush1.bf16.xpose.msra.mxu1 %v1262_v31  ;;  %468 = vmatprep.mubr.bf16.mxu1 %v391_v6 }
  0x65   :  { %476 = vmatprep.subr.bf16.mxu1 %v1247_v11 }
  0x6f   :  { %469 = vmatmul.mubr.bf16.vlgmr.msra.gmra.mrb[4].mxu1 %v390_v12 }
  0x70   :  { %477 = vmatpush1.bf16.xpose.msra.mxu1 %v1249_v15  ;;  %508 = vmatprep.mubr.bf16.mxu1 %v393_v13 }
  0x71   :  { %516 = vmatprep.subr.bf16.mxu1 %v1259_v26 }
  0x7b   :  { %509 = vmatmul.mubr.bf16.vlgmr.msra.gmra.mrb[4].mxu1 %v392_v18 }
  0x7c   :  { %517 = vmatpush1.bf16.xpose.msra.mxu1 %v1267_v42  ;;  %548 = vmatprep.mubr.bf16.mxu1 %v395_v19 }
  0x7d   :  { %1008 = vmatprep.subr.msk.bf16.mxu1 %vm578_vm1, %v1255_v23 }
  0x87   :  { %549 = vmatmul.mubr.bf16.vlgmr.msra.gmra.mrb[4].mxu1 %v394_v20 }
  0x88   :  { %645 = vmatpush1.bf16.msra.mxu1 %v586_v54  ;;  %676 = vmatprep.mubr.bf16.mxu1 %v1178_v55 }
  0x89   :  { %1012 = vmatprep.subr.msk.bf16.mxu1 %vm578_vm1, %v1259_v26 }
 0x122   :  { %v205_v22 = vpop.f32.mrb[0].mxu1  ;;  %v285_v24 = vpop.f32.mrb[0].mxu0 }
 0x123   :  { %v1014_v25 = vadd.f32 %v1005_v21, %v205_v22  ;;  %v207_v27 = vpop.f32.mrb[1].mxu1  ;;  %v287_v5 = vpop.f32.mrb[1].mxu0 }
 0x124   :  { %v208_v28 = vpop.f32.mrb[2].mxu1  ;;  %v288_v29 = vpop.f32.mrb[2].mxu0 }
 0x125   :  { %v1288_v30 = vadd.f32 %v1014_v25, %v285_v24  ;;  %v209_v32 = vpop.f32.mrb[3].mxu1  ;;  %v289_v33 = vpop.f32.mrb[3].mxu0 }
 0x127   :  { %v292_v34 = vsel %vm291_vm0, %v1288_v30, -inf }
 0x128   :  { %293 = vmax.xlane.f32.xlu0 %v292_v34 }
 0x15a   :  { %v550_v35 = vpop.f32.mrb[4].mxu1 }
 0x15b   :  { %v556_v36 = vmul.f32 1e-06, %v550_v35  ;;  %v552_v37 = vpop.f32.mrb[5].mxu1 }
 0x15c   :  { %v553_v38 = vpop.f32.mrb[6].mxu1 }
 0x15d   :  { %v554_v39 = vpop.f32.mrb[7].mxu1  ;;  %v557_v40 = vadd.f32 %v1288_v30, %v556_v36 }
 0x15f   :  { %v558_v41 = vsel %vm291_vm0, %v557_v40, -inf }
 0x160   :  { %559 = vmax.xlane.f32.xlu0 %v558_v41 }
 0x1b5   :  { %v294_v43 = vpop.xlane.xlu0 %293 }
 0x1b6   :  { %v295_v44 = vsub.f32 %v1288_v30, %v294_v43 }
 0x1b8   :  { %v296_v45 = vmul.f32 1.442695, %v295_v44 }
 0x1ba   :  { %1060 = vpow2.f32 %v296_v45 }
 0x1c4   :  { %v1061_v46 = vpop.eup %1060 }
 0x1c5   :  { %v298_v47 = vsel %vm291_vm0, %v1061_v46, 0.0 }
 0x1c6   :  { %299 = vadd.xlane.f32.xlu1 %v298_v47 }
 0x1ed   :  { %v560_v48 = vpop.xlane.xlu0 %559 }
 0x1ee   :  { %v561_v49 = vsub.f32 %v557_v40, %v560_v48 }
 0x1f0   :  { %v562_v50 = vmul.f32 1.442695, %v561_v49 }
 0x1f2   :  { %1062 = vpow2.f32 %v562_v50 }
 0x1fc   :  { %v1063_v51 = vpop.eup %1062 }
 0x1fd   :  { %v564_v52 = vsel %vm291_vm0, %v1063_v51, 0.0 }
 0x1fe   :  { %565 = vadd.xlane.f32.xlu1 %v564_v52 }
 0x253   :  { %v300_v56 = vpop.xlane.xlu1 %299 }
 0x254   :  { %1064 = vlog2.f32 %v300_v56 }
 0x25e   :  { %v1065_v58 = vpop.eup %1064 }
 0x25f   :  { %v302_v59 = vmul.f32 0.6931472, %v1065_v58 }
 0x261   :  { %v1309_v60 = vsub.f32 %v295_v44, %v302_v59 }
 0x263   :  { %v304_v63 = vmul.f32 1.442695, %v1309_v60 }
 0x28b   :  { %v566_v57 = vpop.xlane.xlu1 %565 }
 0x28c   :  { %1066 = vlog2.f32 %v566_v57 }
 0x28d   :  { %1068 = vpow2.f32 %v304_v63 }
 0x296   :  { %v1067_v61 = vpop.eup %1066 }
 0x297   :  { %v568_v62 = vmul.f32 0.6931472, %v1067_v61  ;;  %v1312_v2 = vpop.eup %1068 }
 0x299   :  { %v569_v0 = vsub.f32 %v561_v49, %v568_v62 }
 0x29b   :  { %v570_v1 = vmul.f32 1.442695, %v569_v0 }
 0x29d   :  { %1070 = vpow2.f32 %v570_v1 }
 0x2a7   :  { %v1071_v3 = vpop.eup %1070 }
 0x2a8   :  { %v572_v4 = vsub.f32 %v1071_v3, %v1312_v2 }
 0x2aa   :  { %v573_v6 = vpack.c.bf16 %v572_v4, %v572_v4 }
 0x2ac   :  { %1007 = vmatmul.mubr.msk.bf16.vlgmr.msra.gmra.mrb[4].mxu0 %vm574_vm2, %v573_v6  ;;  %1009 = vmatmul.mubr.msk.bf16.vlgmr.msra.gmra.mrb[8].mxu1 %vm574_vm2, %v573_v6 }
 0x2ad   :  { %686 = vmatpush1.bf16.msra.mxu0 %v592_v7  ;;  %727 = vmatpush1.bf16.msra.mxu1 %v598_v8 }
 0x2ae   :  { %717 = vmatprep.mubr.bf16.mxu0 %v1178_v55  ;;  %758 = vmatprep.mubr.bf16.mxu1 %v1178_v55 }
 0x2af   :  { %801 = vmatprep.subr.bf16.mxu0 %v1243_v9 }
 0x2b4   :  { %1011 = vmatmul.mubr.msk.bf16.vlgmr.msra.gmra.mrb[8].mxu0 %vm574_vm2, %v573_v6  ;;  %1013 = vmatmul.mubr.msk.bf16.vlgmr.msra.gmra.mrb[12].mxu1 %vm574_vm2, %v573_v6 }
 0x2b6   :  { %802 = vmatpush1.bf16.xpose.msra.mxu0 %v1245_v10 }
 0x2b7   :  { %841 = vmatprep.subr.bf16.mxu0 %v1255_v23 }
 0x37f   :  { %v637_v12 = vpop.f32.mrb[4].mxu0  ;;  %v678_v13 = vpop.f32.mrb[8].mxu1 }
 0x380   :  { %v767_v14 = vmul.f32 %v637_v12, %v637_v12  ;;  %v769_v16 = vmul.f32 %v678_v13, %v678_v13  ;;  %v639_v17 = vpop.f32.mrb[5].mxu0  ;;  %v680_v18 = vpop.f32.mrb[9].mxu1 }
 0x381   :  { %v768_v19 = vmul.f32 %v639_v17, %v639_v17  ;;  %v770_v20 = vmul.f32 %v680_v18, %v680_v18  ;;  %v641_v21 = vpop.f32.mrb[6].mxu0  ;;  %v682_v22 = vpop.f32.mrb[10].mxu1 }
 0x382   :  { %v771_v24 = vadd.f32 %v769_v16, %v767_v14  ;;  %v642_v25 = vpop.f32.mrb[7].mxu0  ;;  %v683_v27 = vpop.f32.mrb[11].mxu1 }
 0x383   :  { %v772_v9 = vadd.f32 %v770_v20, %v768_v19 }
 0x387   :  { %v719_v5 = vpop.f32.mrb[8].mxu0  ;;  %v760_v28 = vpop.f32.mrb[12].mxu1 }
 0x388   :  { %v773_v29 = vmul.f32 %v719_v5, %v719_v5  ;;  %v721_v10 = vpop.f32.mrb[9].mxu0  ;;  %v762_v32 = vpop.f32.mrb[13].mxu1  ;;  %v777_v36 = vmul.f32 %v760_v28, %v760_v28 }
 0x389   :  { %v774_v23 = vmul.f32 %v721_v10, %v721_v10  ;;  %v723_v33 = vpop.f32.mrb[10].mxu0  ;;  %v764_v34 = vpop.f32.mrb[14].mxu1  ;;  %v778_v40 = vmul.f32 %v762_v32, %v762_v32 }
 0x38a   :  { %v775_v35 = vadd.f32 %v773_v29, %v771_v24  ;;  %v724_v37 = vpop.f32.mrb[11].mxu0  ;;  %v765_v38 = vpop.f32.mrb[15].mxu1 }
 0x38b   :  { %v776_v39 = vadd.f32 %v774_v23, %v772_v9 }
 0x38c   :  { %v779_v41 = vadd.f32 %v777_v36, %v775_v35 }
 0x38d   :  { %v780_v43 = vadd.f32 %v778_v40, %v776_v39 }
 0x38e   :  { %v781_v44 = vmax.f32 %v779_v41, 1e-24 }
 0x38f   :  { %v782_v45 = vmax.f32 %v780_v43, 1e-24 }
 0x390   :  { %1072 = vrsqrt.f32 %v781_v44 }
 0x391   :  { %1074 = vrsqrt.f32 %v782_v45 }
 0x39a   :  { %v1073_v46 = vpop.eup %1072 }
 0x39b   :  { %v1075_v47 = vpop.eup %1074  ;;  %v791_v48 = vmul.f32 %v1073_v46, %v760_v28  ;;  %v785_v49 = vmul.f32 %v1073_v46, %v637_v12  ;;  %v787_v50 = vmul.f32 %v1073_v46, %v678_v13  ;;  %v789_v51 = vmul.f32 %v1073_v46, %v719_v5 }
 0x39c   :  { %v792_v52 = vmul.f32 %v1075_v47, %v762_v32  ;;  %v786_v53 = vmul.f32 %v1075_v47, %v639_v17  ;;  %v788_v54 = vmul.f32 %v1075_v47, %v680_v18  ;;  %v790_v55 = vmul.f32 %v1075_v47, %v721_v10 }
 0x39d   :  { %v793_v57 = vpack.c.bf16 %v785_v49, %v785_v49  ;;  %v795_v59 = vpack.c.bf16 %v787_v50, %v787_v50  ;;  %v797_v62 = vpack.c.bf16 %v789_v51, %v789_v51  ;;  %v799_v0 = vpack.c.bf16 %v791_v48, %v791_v48 }
 0x39e   :  { %v794_v56 = vpack.c.bf16 %v786_v53, %v786_v53  ;;  %v796_v58 = vpack.c.bf16 %v788_v54, %v788_v54  ;;  %v798_v61 = vpack.c.bf16 %v790_v55, %v790_v55  ;;  %v800_v63 = vpack.c.bf16 %v792_v52, %v792_v52 }
 0x3a0   :  { %833 = vmatprep.mubr.bf16.mxu0 %v794_v56 }
 0x3a1   :  { %834 = vmatmul.mubr.bf16.vlgmr.msra.gmra.mrb[12].mxu0 %v793_v57 }
 0x3a2   :  { %842 = vmatpush1.bf16.xpose.msra.mxu0 %v1262_v31  ;;  %873 = vmatprep.mubr.bf16.mxu0 %v796_v58 }
 0x3a3   :  { %881 = vmatprep.subr.bf16.mxu0 %v1247_v11 }
 0x3ad   :  { %874 = vmatmul.mubr.bf16.vlgmr.msra.gmra.mrb[12].mxu0 %v795_v59 }
 0x3ae   :  { %882 = vmatpush1.bf16.xpose.msra.mxu0 %v1249_v15  ;;  %913 = vmatprep.mubr.bf16.mxu0 %v798_v61 }
 0x3af   :  { %921 = vmatprep.subr.bf16.mxu0 %v1259_v26 }
 0x3b9   :  { %914 = vmatmul.mubr.bf16.vlgmr.msra.gmra.mrb[12].mxu0 %v797_v62 }
 0x3ba   :  { %922 = vmatpush1.bf16.xpose.msra.mxu0 %v1267_v42  ;;  %953 = vmatprep.mubr.bf16.mxu0 %v800_v63 }
 0x3c5   :  { %954 = vmatmul.mubr.bf16.vlgmr.msra.gmra.mrb[12].mxu0 %v799_v0 }
 0x498   :  { %v955_v31 = vpop.f32.mrb[12].mxu0 }
 0x499   :  { %v961_v1 = vmul.f32 2.0, %v955_v31  ;;  %v957_v3 = vpop.f32.mrb[13].mxu0 }
 0x49a   :  { %v958_v11 = vpop.f32.mrb[14].mxu0 }
 0x49b   :  { %v959_v4 = vpop.f32.mrb[15].mxu0  ;;  %v962_v6 = vadd.f32 %v1288_v30, %v961_v1 }
 0x49d   :  { %v963_v15 = vsel %vm291_vm0, %v962_v6, -inf }
 0x49e   :  { %964 = vmax.xlane.f32.xlu0 %v963_v15 }
 0x52b   :  { %v965_v7 = vpop.xlane.xlu0 %964 }
 0x52c   :  { %v966_v26 = vsub.f32 %v962_v6, %v965_v7 }
 0x52e   :  { %v967_v8 = vmul.f32 1.442695, %v966_v26 }
 0x530   :  { %1076 = vpow2.f32 %v967_v8 }
 0x53a   :  { %v1077_v12 = vpop.eup %1076 }
 0x53b   :  { %v969_v42 = vsel %vm291_vm0, %v1077_v12, 0.0 }
 0x53c   :  { %970 = vadd.xlane.f32.xlu1 %v969_v42 }
 0x5c9   :  { %v971_v13 = vpop.xlane.xlu1 %970 }
 0x5ca   :  { %1078 = vlog2.f32 %v971_v13 }
 0x5d4   :  { %v1079_v14 = vpop.eup %1078 }
 0x5d5   :  { %v973_v16 = vmul.f32 0.6931472, %v1079_v14 }
 0x5d7   :  { %v974_v17 = vsub.f32 %v966_v26, %v973_v16 }
 0x5d9   :  { %v975_v18 = vsub.f32 %v1309_v60, %v974_v17 }
 0x5db   :  { %v976_v30 = vmul.f32 %v1312_v2, %v975_v18 }
 0x5dd   :  { %v977_v19 = vsel %vm291_vm0, %v976_v30, 0.0 }
 0x5de   :  { %978 = vadd.xlane.f32.xlu0 %v977_v19 }
 0x66b   :  { %v979_v20 = vpop.xlane.xlu0 %978 }
 0x66c   :  { %v980_v21 = vrot.slane %v979_v20, 4 }
 0x66e   :  { %v981_v22 = vadd.f32 %v980_v21, %v979_v20 }
 0x670   :  { %v982_v24 = vrot.slane %v981_v22, 2 }
 0x672   :  { %v983_v25 = vadd.f32 %v982_v24, %v981_v22 }
 0x674   :  { %v984_v27 = vrot.slane %v983_v25, 1 }
 0x676   :  { %v985_v9 = vadd.f32 %v984_v27, %v983_v25 }
 0x678   :  { %1048 = vpush %v985_v9 }
 0x6a9   :  { %s1049_s25 = spop %1048 }
 0x6aa   :  { %v987_v5 = vstv %s1049_s25 }
 0x6ab   :  { %988 = vst [vmem:[#allocation8] sm:$0x1] %v987_v5 }
 0x6ac   :  { %1157 = shalt.err (!%p1154_p0)
}
 0x6ad   :  { %s1158_s30 = scalar_lea.hbm %s1349_s4, 16 }
 0x6ae   :  { %p1159_p1 = scmp.ne.s32.totalorder %s1349_s4, %s1158_s30  ;;  %p1162_p2 = scmp.lt.u32.totalorder %s1158_s30, %s1349_s4 }
 0x6b0   :  { %p1164_p3 = pnand %p1162_p2, %p1159_p1 }
 0x6b2   :  { %1167 = shalt.err (!%p1164_p3)
}
 0x6b3   :  { %998 = dma.vmem_to_hbm [thread:$0]  %s996_s24, 16, %s1349_s4, [#allocation4]  }
 0x6b4   :  { %1172 = dma.done.wait [#allocation4], 16  }
 0x6b5   :  { %1173 = vsyncadd [#allocation4], 4294967280 }
 0x6b6   :  { %1002 = vsyncpa [#allocation3], 1 }
 0x6b7   :  { %1003 = vsyncpa [#allocation6], 1 }
 0x6b8   :  { %1004 = vsyncpa [#allocation4], 1 }

</bundles_post_ra>
